<compile_context>
chip_gen: v6e
topology: v6e:2x2x1
jax: 0.10.0
libtpu: 0.0.40
codegen_flags: <defaults>
</compile_context>

<pallas_src>
import jax
import jax.numpy as jnp
from jax.experimental import pallas as pl
from jax.experimental.pallas import tpu as pltpu


def _lstm_cell_kernel(feats_ref, h0_ref, w_ref, b_ref, c_prev_ref, out_ref):
    """Fused single-block LSTM cell: one matmul for all gates, packed output."""
    # Fuse the row-concat of feats and the recurrent state into the kernel.
    x = jnp.concatenate([feats_ref[...], h0_ref[...]], axis=0)   # (M, D_in)
    c_prev = c_prev_ref[...]                                     # (M, D_out)
    d = c_prev_ref.shape[1]

    # TODO(synk): reference adds cal_hurst(feats) (per-row Hurst exponent via
    # the `hurst` package on detached numpy) to the f-gate pre-activation; the
    # R/S Hurst estimator has no clean Pallas equivalent and is omitted here.

    # One fused matmul for all four gates: (M, D_in) @ (D_in, 4*D_out).
    pre = jnp.dot(x, w_ref[...], preferred_element_type=jnp.float32) + b_ref[...]

    f = jax.nn.sigmoid(pre[:, 0 * d:1 * d])
    i = jax.nn.sigmoid(pre[:, 1 * d:2 * d])
    ct = jnp.tanh(pre[:, 2 * d:3 * d])
    o = jax.nn.sigmoid(pre[:, 3 * d:4 * d])

    c_new = f * c_prev + i * ct
    h_new = o * jnp.tanh(c_new)

    # Single packed output slab: [o | h_new | c_new]  -> one store, one DMA.
    out_ref[...] = jnp.concatenate([o, h_new, c_new], axis=1)


def lstm_forward(feats, h0, c0, params):
    """feats: (N, D_in); h0: (D_in, D_in); c0: (N + D_in, D_out).

    params: {"w_all": (D_in, 4*D_out), "b_all": (1, 4*D_out)} with gate order
    [f, i, ct, o].
    """
    feats = feats.astype(jnp.float32)
    h0 = h0.astype(jnp.float32)
    c0 = c0.astype(jnp.float32)

    M = feats.shape[0] + h0.shape[0]
    D_out = params["w_all"].shape[1] // 4
    assert c0.shape == (M, D_out), "c0 must broadcast elementwise against gates"

    vmem = pl.BlockSpec(memory_space=pltpu.MemorySpace.VMEM)

    packed = pl.pallas_call(
        _lstm_cell_kernel,
        out_shape=jax.ShapeDtypeStruct((M, 3 * D_out), jnp.float32),
        in_specs=[vmem] * 5,
        out_specs=vmem,
    )(feats, h0, params["w_all"], params["b_all"], c0)

    o = packed[:, 0 * D_out:1 * D_out]
    h_new = packed[:, 1 * D_out:2 * D_out]
    c_new = packed[:, 2 * D_out:3 * D_out]
    return o, h_new, c_new


def _xavier_uniform(key, shape):
    """torch.nn.init.xavier_uniform_ for 2-D tensors: fan_out, fan_in = shape."""
    fan_out, fan_in = shape
    bound = jnp.sqrt(6.0 / (fan_in + fan_out))
    return jax.random.uniform(key, shape, jnp.float32, -bound, bound)


def init_params(key, d_in, d_out):
    """Deterministic synthetic init of the four Linear layers, packed:
    w_all is (D_in, 4*D_out) = [Wf | Wi | Wct | Wo] (each pre-transposed),
    b_all is (1, 4*D_out)."""
    ks = jax.random.split(key, 8)
    ws, bs = [], []
    for kw, kb in zip(ks[0::2], ks[1::2]):
        ws.append(_xavier_uniform(kw, (d_out, d_in)).T)            # (D_in, D_out)
        bs.append(jax.random.uniform(kb, (1, d_out), jnp.float32, -0.1, 0.1))
    return {
        "w_all": jnp.concatenate(ws, axis=1),                      # (D_in, 4*D_out)
        "b_all": jnp.concatenate(bs, axis=1),                      # (1, 4*D_out)
    }


if __name__ == "__main__":
    # Shapes implied by the module: dim_in = 4, dim_out = 2, feats = (4, 4)
    # so that cat([feats, h0]) has 8 rows and gates are (8, 2), matching the
    # hard-coded c0 shape torch.empty(8, 2).
    D_IN, D_OUT, N = 4, 2, 4

    root = jax.random.PRNGKey(0)
    k_feats, k_h, k_c, k_params = jax.random.split(root, 4)

    feats = jax.random.normal(k_feats, (N, D_IN), jnp.float32)
    h0 = _xavier_uniform(k_h, (D_IN, D_IN))          # get_state(): (dim_in, dim_in)
    c0 = _xavier_uniform(k_c, (N + D_IN, D_OUT))     # get_state(): (8, 2)
    params = init_params(k_params, D_IN, D_OUT)

    o, h_new, c_new = lstm_forward(feats, h0, c0, params)
    jax.block_until_ready((o, h_new, c_new))

    assert o.shape == (N + D_IN, D_OUT)
    assert h_new.shape == (N + D_IN, D_OUT)
    assert c_new.shape == (N + D_IN, D_OUT)
    assert jnp.all(jnp.isfinite(o)) and jnp.all(jnp.isfinite(h_new)) and jnp.all(jnp.isfinite(c_new))

    print("KERNEL_OK")
</pallas_src>

<mosaic_0001>
module attributes {stable_mosaic.version = 11 : i64} {
  func.func @_lstm_cell_kernel(%arg0: memref<4x4xf32, #tpu.memory_space<vmem>>, %arg1: memref<4x4xf32, #tpu.memory_space<vmem>>, %arg2: memref<4x8xf32, #tpu.memory_space<vmem>>, %arg3: memref<1x8xf32, #tpu.memory_space<vmem>>, %arg4: memref<8x2xf32, #tpu.memory_space<vmem>>, %arg5: memref<8x6xf32, #tpu.memory_space<vmem>>) attributes {dimension_semantics = [], scalar_prefetch = 0 : i64, scratch_operands = 0 : i64, tpu.core_type = #tpu.core_type<tc>} {
    %c0 = arith.constant 0 : index
    %c0_0 = arith.constant 0 : index
    %0 = vector.load %arg0[%c0, %c0_0] : memref<4x4xf32, #tpu.memory_space<vmem>>, vector<4x4xf32>
    %c0_1 = arith.constant 0 : index
    %c0_2 = arith.constant 0 : index
    %1 = vector.load %arg1[%c0_1, %c0_2] : memref<4x4xf32, #tpu.memory_space<vmem>>, vector<4x4xf32>
    %2 = tpu.concatenate %0, %1 in 0 : vector<4x4xf32>, vector<4x4xf32> -> vector<8x4xf32>
    %c0_3 = arith.constant 0 : index
    %c0_4 = arith.constant 0 : index
    %3 = vector.load %arg4[%c0_3, %c0_4] : memref<8x2xf32, #tpu.memory_space<vmem>>, vector<8x2xf32>
    %c0_5 = arith.constant 0 : index
    %c0_6 = arith.constant 0 : index
    %4 = vector.load %arg2[%c0_5, %c0_6] : memref<4x8xf32, #tpu.memory_space<vmem>>, vector<4x8xf32>
    %cst = arith.constant dense<0.000000e+00> : vector<8x8xf32>
    %5 = tpu.matmul %2, %4, %cst {dimension_numbers = #tpu.dot_dimension_numbers<[1], [0], [0], [1], [0, 0, 1, 1], [], []>} : vector<8x4xf32>, vector<4x8xf32>, vector<8x8xf32> -> vector<8x8xf32>
    %c0_7 = arith.constant 0 : index
    %c0_8 = arith.constant 0 : index
    %6 = vector.load %arg3[%c0_7, %c0_8] : memref<1x8xf32, #tpu.memory_space<vmem>>, vector<1x8xf32>
    %7 = vector.broadcast %6 : vector<1x8xf32> to vector<8x8xf32>
    %8 = arith.addf %5, %7 : vector<8x8xf32>
    %9 = vector.extract_strided_slice %8 {offsets = [0, 0], sizes = [8, 2], strides = [1, 1]} : vector<8x8xf32> to vector<8x2xf32>
    %10 = arith.negf %9 : vector<8x2xf32>
    %11 = math.exp %10 : vector<8x2xf32>
    %cst_9 = arith.constant 1.000000e+00 : f32
    %12 = vector.broadcast %cst_9 : f32 to vector<8x2xf32>
    %13 = arith.addf %12, %11 : vector<8x2xf32>
    %14 = arith.divf %12, %13 : vector<8x2xf32>
    %15 = vector.extract_strided_slice %8 {offsets = [0, 2], sizes = [8, 2], strides = [1, 1]} : vector<8x8xf32> to vector<8x2xf32>
    %16 = arith.negf %15 : vector<8x2xf32>
    %17 = math.exp %16 : vector<8x2xf32>
    %cst_10 = arith.constant 1.000000e+00 : f32
    %18 = vector.broadcast %cst_10 : f32 to vector<8x2xf32>
    %19 = arith.addf %18, %17 : vector<8x2xf32>
    %20 = arith.divf %18, %19 : vector<8x2xf32>
    %21 = vector.extract_strided_slice %8 {offsets = [0, 4], sizes = [8, 2], strides = [1, 1]} : vector<8x8xf32> to vector<8x2xf32>
    %22 = math.tanh %21 : vector<8x2xf32>
    %23 = vector.extract_strided_slice %8 {offsets = [0, 6], sizes = [8, 2], strides = [1, 1]} : vector<8x8xf32> to vector<8x2xf32>
    %24 = arith.negf %23 : vector<8x2xf32>
    %25 = math.exp %24 : vector<8x2xf32>
    %cst_11 = arith.constant 1.000000e+00 : f32
    %26 = vector.broadcast %cst_11 : f32 to vector<8x2xf32>
    %27 = arith.addf %26, %25 : vector<8x2xf32>
    %28 = arith.divf %26, %27 : vector<8x2xf32>
    %29 = arith.mulf %14, %3 : vector<8x2xf32>
    %30 = arith.mulf %20, %22 : vector<8x2xf32>
    %31 = arith.addf %29, %30 : vector<8x2xf32>
    %32 = math.tanh %31 : vector<8x2xf32>
    %33 = arith.mulf %28, %32 : vector<8x2xf32>
    %34 = tpu.concatenate %28, %33, %31 in 1 : vector<8x2xf32>, vector<8x2xf32>, vector<8x2xf32> -> vector<8x6xf32>
    %c0_12 = arith.constant 0 : index
    %c0_13 = arith.constant 0 : index
    %35 = vector.load %arg5[%c0_12, %c0_13] : memref<8x6xf32, #tpu.memory_space<vmem>>, vector<8x6xf32>
    tpu.vector_store %arg5[%c0_12, %c0_13], %34 {strides = array<i32>} : memref<8x6xf32, #tpu.memory_space<vmem>>, vector<8x6xf32>,
    return
  }
}

</mosaic_0001>

<bundles_post_ra>
// kernel: tpu_custom_call.1
= control target key start
LH: loop header
LB: loop body
LE: loop exit
PB: predicated region body
PF: predicated region fallthrough
CT: control target
= control target key end

     0   :  { %vm26_vm0 = vcmask 1043456   ;;  %v218_v1 = vmov 0.0   ;;  %vm219_vm1 = vmmov 0   ;;  %vm37_vm2 = vcmask 31744   ;;  %s276_s0 = inlined_call_operand.vmem [shape: f32[4,4], index: 0, kind: input, shape index: {}]   ;;  %s277_s1 = inlined_call_operand.vmem [shape: f32[4,4], index: 1, kind: input, shape index: {}]   ;;  %s278_s2 = inlined_call_operand.vmem [shape: f32[4,8], index: 2, kind: input, shape index: {}]   ;;  %s279_s3 = inlined_call_operand.vmem [shape: f32[1,8], index: 3, kind: input, shape index: {}]   ;;  %s280_s4 = inlined_call_operand.vmem [shape: f32[8,2], index: 4, kind: input, shape index: {}]   ;;  %s281_s5 = inlined_call_operand.hbm [shape: f32[8,6], index: 5, kind: output, shape index: {}]  }
   0x1   :  { %v29_v0 = vld [vmem:[%s278_s2] sm:$0xf]  ;;  %175 = vmatprep.subr.mxu0 %v218_v1  ;;  %177 = vmatprep.mubr.msk.f32.mxu0 %vm219_vm1, %v218_v1 }
   0x2   :  { %v21_v2 = vld [vmem:[%s276_s0] sm:$0xf]  ;;  %176 = vmatpush3.msk.msra.mxu0 %vm26_vm0, %v29_v0 }
   0x3   :  { %v22_v3 = vld [vmem:[%s277_s1] sm:$0xf] }
   0x4   :  { %v24_v4 = vrot.slane %v22_v3, 4 }
   0x5   :  { %10 = vsyncpa [#allocation3], 0  ;;  %v169_v6 = vld [vmem:[%s279_s3] ss:$0 sm:$0xff]  ;;  %s220_s0 = smov 126   ;;  %s221_s3 = smov 6  }
   0x6   :  { %v27_v5 = vsel %vm26_vm0, %v21_v2, %v24_v4  ;;  %v28_v17 = vld [vmem:[%s280_s4] sm:$0xff]  ;;  %s222_s26 = smov 122   ;;  %s223_s27 = smov 4   ;;  %vm150_vm3 = vcmask 15360   ;;  %vm153_vm4 = vcmask 48128  }
   0x7   :  { %178 = vmatmul.mubr.msk.f32.vlgmr.msra.gmra.mxu0 %vm37_vm2, %v27_v5  ;;  %s224_s28 = smov 124   ;;  %s225_s29 = smov [#allocation2]  }
   0x8   :  { %s161_s30 = sshll.u32 %s225_s29, 4  ;;  %s162_s30 = int_to_ptr.vmem [resolvable:$true] %s161_s30 }
   0x9   :  { %s196_s4 = scalar_lea.vmem %s162_s30, 128  ;;  %p201_p1 = scmp.lt.s32.totalorder %s162_s30, %s162_s30 }
   0xa   :  { %p197_p0 = scmp.ne.s32.totalorder %s162_s30, %s196_s4  ;;  %p202_p2 = scmp.lt.s32.totalorder %s196_s4, %s196_s4 }
   0xc   :  { %p203_p3 = por %p202_p2, %p201_p1 }
   0xe   :  { %p204_p4 = pnand %p203_p3, %p197_p0 }
  0xc7   :  { %v110_v7 = vpop.f32.mrf.mxu0 }
  0xc8   :  { %v111_v8 = vadd.f32 %v169_v6, %v110_v7 }
  0xc9   :  { %v179_v9 = vpop.f32.mrf.mxu0 }
  0xca   :  { %188 = vtanh.f32 %v111_v8  ;;  %v172_v11 = vmul.f32 -1.442695, %v111_v8 }
  0xcc   :  { %190 = vpow2.f32 %v172_v11 }
  0xd7   :  { %v189_v10 = vpop.eup %188 }
  0xd8   :  { %123 = vrot.lane.b32.xlu0 %v189_v10, %s220_s0 }
  0xd9   :  { %v191_v12 = vpop.eup %190 }
  0xda   :  { %v117_v13 = vadd.f32 1.0, %v191_v12 }
  0xdc   :  { %192 = vrcp.f32 %v117_v13 }
  0xe9   :  { %v193_v14 = vpop.eup %192 }
  0xea   :  { %v121_v18 = vmul.f32 %v193_v14, %v28_v17 }
 0x14a   :  { %v124_v15 = vpop.permute.xlu0 %123 }
 0x14b   :  { %v126_v16 = vmul.f32 %v193_v14, %v124_v15 }
 0x14d   :  { %128 = vrot.lane.b32.xlu0 %v126_v16, %s220_s0 }
 0x1bf   :  { %v129_v19 = vpop.permute.xlu0 %128 }
 0x1c0   :  { %v131_v20 = vadd.f32 %v129_v19, %v121_v18 }
 0x1c2   :  { %194 = vtanh.f32 %v131_v20 }
 0x1cf   :  { %v195_v21 = vpop.eup %194 }
 0x1d0   :  { %134 = vrot.lane.b32.xlu1 %v195_v21, %s221_s3 }
 0x1d4   :  { %139 = vrot.lane.b32.xlu1 %v193_v14, %s222_s26 }
 0x1d8   :  { %147 = vrot.lane.b32.xlu1 %v131_v20, %s223_s27 }
 0x242   :  { %v135_v22 = vpop.permute.xlu1 %134 }
 0x243   :  { %v137_v23 = vmul.f32 %v193_v14, %v135_v22 }
 0x245   :  { %143 = vrot.lane.b32.xlu0 %v137_v23, %s224_s28 }
 0x246   :  { %v140_v24 = vpop.permute.xlu1 %139 }
 0x24a   :  { %v148_v26 = vpop.permute.xlu1 %147 }
 0x2b7   :  { %v144_v25 = vpop.permute.xlu0 %143 }
 0x2b8   :  { %v151_v27 = vsel %vm150_vm3, %v140_v24, %v144_v25 }
 0x2b9   :  { %v152_v28 = vsel %vm37_vm2, %v151_v27, %v148_v26 }
 0x2ba   :  { %154 = vst.msk [vmem:[#allocation2] sm:$0xff] %vm153_vm4, %v152_v28 }
 0x2bb   :  { %207 = shalt.err (!%p204_p4)
}
 0x2bc   :  { %164 = dma.vmem_to_hbm [thread:$0]  %s162_s30, 128, %s281_s5, [#allocation3]  }
 0x2bd   :  { %216 = dma.done.wait [#allocation3], 128  }
 0x2be   :  { %217 = vsyncadd [#allocation3], 4294967168 }
 0x2bf   :  { %168 = vsyncpa [#allocation3], 1 }

</bundles_post_ra>
